<compile_context>
chip_gen: v7x
topology: tpu7x:2x2x1
jax: 0.10.0
libtpu: 0.0.40
codegen_flags: <defaults>
</compile_context>

<pallas_src>
import functools

import jax
import jax.numpy as jnp
from jax.experimental import pallas as pl
from jax.experimental.pallas import tpu as pltpu

NHID = 128          # q-network hidden / output width (hard-coded in the module)
_NEG = -1e30        # "minus infinity" that stays NaN-free under exp()


def _round_up(x, m):
    return (x + m - 1) // m * m


# ---------------------------------------------------------------------------
# Fused kernel: q-net recompute + class-major scores + flash-style softmax/B.
# ---------------------------------------------------------------------------
def _bag_kernel(n_ref, x_ref, wq1_ref, bq1_ref, wq2_ref, bq2_ref, qmax_ref,
                s_ref, acc_ref, m_ref, l_ref,
                m_sc, l_sc, acc_sc,
                *, tile_n, tiles_per_split, scale):
    i = pl.program_id(1)

    @pl.when(i == 0)
    def _init():
        m_sc[...] = jnp.full(m_sc.shape, _NEG, jnp.float32)
        l_sc[...] = jnp.zeros(l_sc.shape, jnp.float32)
        acc_sc[...] = jnp.zeros(acc_sc.shape, jnp.float32)

    n_valid = n_ref[0]
    # Unclamped tile slot -> global row offset (phantom / padded slots mask out).
    slot = pl.program_id(0) * tiles_per_split + i
    row0 = slot * tile_n

    # Mask rows outside the bag (ragged last tile, phantom slots, caller-side bucket
    # padding) BEFORE any matmul so OOB-read garbage can never reach an accumulator,
    # then drop to bf16 once for all MXU work.
    rows = row0 + jax.lax.broadcasted_iota(jnp.int32, (tile_n, 1), 0)
    feats_bf = jnp.where(rows < n_valid, x_ref[...], 0).astype(jnp.bfloat16)

    # q-network recomputed on the tile already in VMEM (Q is never stored to HBM).
    hidden = jnp.maximum(
        jnp.dot(feats_bf, wq1_ref[...], preferred_element_type=jnp.float32)
        + bq1_ref[...], 0.0)                                           # [TN, 128]
    q = jnp.tanh(
        jnp.dot(hidden.astype(jnp.bfloat16), wq2_ref[...],
                preferred_element_type=jnp.float32) + bq2_ref[...])    # [TN, 128]

    # Class-major raw scores: s[k, r] = <q_max_k, Q_r> / sqrt(128).
    s = jax.lax.dot_general(
        qmax_ref[...], q.astype(jnp.bfloat16),
        dimension_numbers=(((1,), (1,)), ((), ())),
        preferred_element_type=jnp.float32) * scale                    # [CP, TN]
    col = row0 + jax.lax.broadcasted_iota(jnp.int32, s.shape, 1)
    s = jnp.where(col < n_valid, s, _NEG)
    s_ref[...] = s                                                     # 32 B/instance

    # Flash-style online softmax over the instance axis (kept class-major, no transposes).
    m_prev = m_sc[...]
    m_new = jnp.maximum(m_prev, jnp.max(s, axis=1, keepdims=True))     # [CP, 1]
    alpha = jnp.exp(m_prev - m_new)
    p = jnp.exp(s - m_new)                                             # [CP, TN]
    l_sc[...] = alpha * l_sc[...] + jnp.sum(p, axis=1, keepdims=True)
    acc_sc[...] = alpha * acc_sc[...] + jax.lax.dot_general(
        p.astype(jnp.bfloat16), feats_bf,
        dimension_numbers=(((1,), (0,)), ((), ())),
        preferred_element_type=jnp.float32)                            # [CP, ndim]
    m_sc[...] = m_new

    @pl.when(i == pl.num_programs(1) - 1)
    def _finalize():
        acc_ref[...] = acc_sc[...]
        m_ref[...] = m_sc[...]
        l_ref[...] = l_sc[...]


# ---------------------------------------------------------------------------
# Tiny helpers shared by the wrapper and the reference (bf16 MXU / f32 accum).
# ---------------------------------------------------------------------------
def _mm_bf16(a, b):
    return jnp.dot(a.astype(jnp.bfloat16), b.astype(jnp.bfloat16),
                   preferred_element_type=jnp.float32)


def _q_net(z, params):
    h = jnp.maximum(_mm_bf16(z, params["w_q1"]) + params["b_q1"], 0.0)
    return jnp.tanh(_mm_bf16(h, params["w_q2"]) + params["b_q2"])


# ---------------------------------------------------------------------------
# Wrapper: BClassifier.forward(feats, c) -> (C_logits, A, B)
# ---------------------------------------------------------------------------
@functools.partial(jax.jit, static_argnames=("tile_n", "num_splits"))
def bclassifier_forward(feats, c, params, *, n_valid=None, tile_n=2048,
                        num_splits=2):
    """Pallas BClassifier forward.

    feats:   [N, ndim] instance embeddings (f32 or bf16).
    c:       [N, n_classes] instance logits (the module's second input).
    n_valid: optional runtime bag length (<= N) when feats/c are bucket-padded;
             rows >= n_valid get zero attention and A rows >= n_valid are 0.
    num_splits: leading "parallel" grid axis; 2 uses both v7x TensorCores,
             1 avoids the single redundant tile on 1-TC parts (v5e/v6e).
    """
    n_static, ndim = feats.shape
    n_classes = c.shape[1]
    cp = _round_up(max(n_classes, 8), 8)          # sublane-padded class count
    if n_valid is None:
        n_valid = n_static
    n_arr = jnp.reshape(jnp.asarray(n_valid, jnp.int32), (1,))

    # Instance tile: multiple of 128 rows -> lane-dense score stores, dense packing.
    tn = min(int(tile_n), _round_up(n_static, 128))
    tn = max(128, _round_up(tn, 128))
    n_row_blocks = pl.cdiv(n_static, tn)
    tiles_per_split = pl.cdiv(n_row_blocks, num_splits)
    n_slots = num_splits * tiles_per_split

    # Critical instances (per-class argmax of the *given* c) and their queries:
    # O(n_classes) work, done in plain JAX.  q is row-wise so q(feats[idx]) == Q[idx].
    row_ids = jnp.arange(n_static)[:, None]
    c_masked = jnp.where(row_ids < n_valid, c, -jnp.inf)
    idx = jnp.argmax(c_masked, axis=0)                                  # [C]
    q_max = _q_net(feats[idx].astype(jnp.float32), params)              # [C, 128]
    q_max = jnp.pad(q_max.astype(jnp.bfloat16), ((0, cp - n_classes), (0, 0)))

    w_q1 = params["w_q1"].astype(jnp.bfloat16)
    w_q2 = params["w_q2"].astype(jnp.bfloat16)
    b_q1 = params["b_q1"].astype(jnp.float32)
    b_q2 = params["b_q2"].astype(jnp.float32)

    kernel = functools.partial(_bag_kernel, tile_n=tn,
                               tiles_per_split=tiles_per_split,
                               scale=float(NHID) ** -0.5)

    const = lambda shape: pl.BlockSpec(shape, lambda h, i, n: (0, 0))

    def feats_map(h, i, n):
        # Clamp phantom slots (odd tile counts / tiny bags) to the last real block;
        # their columns are >= n_valid so they are fully masked in the kernel.
        return (jnp.minimum(h * tiles_per_split + i, n_row_blocks - 1), 0)

    scores, acc_p, m_p, l_p = pl.pallas_call(
        kernel,
        grid_spec=pltpu.PrefetchScalarGridSpec(
            num_scalar_prefetch=1,
            grid=(num_splits, tiles_per_split),
            in_specs=[
                pl.BlockSpec((tn, ndim), feats_map),          # feats tile (orig dtype)
                const((ndim, NHID)),                          # w_q1 (resident)
                const((1, NHID)),                             # b_q1
                const((NHID, NHID)),                          # w_q2
                const((1, NHID)),                             # b_q2
                const((cp, NHID)),                            # q_max
            ],
            out_specs=(
                pl.BlockSpec((cp, tn),
                             lambda h, i, n: (0, h * tiles_per_split + i)),
                pl.BlockSpec((None, cp, ndim), lambda h, i, n: (h, 0, 0)),
                pl.BlockSpec((None, cp, 1), lambda h, i, n: (h, 0, 0)),
                pl.BlockSpec((None, cp, 1), lambda h, i, n: (h, 0, 0)),
            ),
            scratch_shapes=[
                pltpu.VMEM((cp, 1), jnp.float32),     # running max
                pltpu.VMEM((cp, 1), jnp.float32),     # running sum
                pltpu.VMEM((cp, ndim), jnp.float32),  # running softmax^T V accumulator
            ],
        ),
        out_shape=(
            jax.ShapeDtypeStruct((cp, n_slots * tn), jnp.float32),      # raw scores
            jax.ShapeDtypeStruct((num_splits, cp, ndim), jnp.float32),  # acc partials
            jax.ShapeDtypeStruct((num_splits, cp, 1), jnp.float32),     # m partials
            jax.ShapeDtypeStruct((num_splits, cp, 1), jnp.float32),     # l partials
        ),
        compiler_params=pltpu.CompilerParams(
            dimension_semantics=("parallel", "arbitrary"),
            vmem_limit_bytes=48 * 1024 * 1024),
    )(n_arr, feats, w_q1, b_q1, w_q2, b_q2, q_max)

    # Merge the per-split flash partials (standard m/l rescale); empty splits carry
    # m = -1e30 and are killed by exp(m_h - m_tot) == 0.
    m_tot = jnp.max(m_p, axis=0)                                        # [cp, 1]
    w = jnp.exp(m_p - m_tot[None])                                      # [S, cp, 1]
    l_tot = jnp.sum(w * l_p, axis=0)                                    # [cp, 1]
    acc = jnp.sum(w * acc_p, axis=0)                                    # [cp, ndim]
    bag = (acc / jnp.where(l_tot > 0, l_tot, 1.0))[:n_classes]          # [C, ndim]

    # Attention matrix A (softmax over instances), exactly as the module returns it.
    a_cm = scores[:n_classes, :n_static]                                # [C, N]
    A = jax.nn.softmax(a_cm, axis=1).T                                  # [N, C]

    # fcc: Conv1d(n_classes, n_classes, kernel_size=ndim) on B[None] == a matvec.
    w2 = params["w_fcc"].reshape(n_classes, n_classes * ndim)
    logits = bag.reshape(1, n_classes * ndim) @ w2.T + params["b_fcc"]  # [1, C]
    return logits, A, bag


# ---------------------------------------------------------------------------
# Parameter init (matches the PyTorch module's parameter shapes) and reference.
# ---------------------------------------------------------------------------
def init_params(key, ndim, n_classes):
    ks = jax.random.split(key, 6)

    def unif(k, shape, fan_in):
        bound = 1.0 / jnp.sqrt(jnp.float32(fan_in))
        return jax.random.uniform(k, shape, jnp.float32, -bound, bound)

    return {
        # BClassifier.q : Linear(ndim,128) -> ReLU -> Linear(128,128) -> Tanh
        "w_q1": unif(ks[0], (ndim, NHID), ndim),
        "b_q1": unif(ks[1], (1, NHID), ndim),
        "w_q2": unif(ks[2], (NHID, NHID), NHID),
        "b_q2": unif(ks[3], (1, NHID), NHID),
        # BClassifier.fcc : Conv1d(n_classes, n_classes, kernel_size=ndim)
        "w_fcc": unif(ks[4], (n_classes, n_classes, ndim), n_classes * ndim),
        "b_fcc": unif(ks[5], (1, n_classes), n_classes * ndim),
    }


def bclassifier_reference(feats, c, params):
    """Plain-JAX reference mirroring the kernel's bf16-operand / f32-accum math."""
    feats = feats.astype(jnp.float32)
    Q = _q_net(feats, params)
    idx = jnp.argmax(c, axis=0)                    # m_indices[0, :] (per-class top-1)
    q_max = _q_net(feats[idx], params)
    A = _mm_bf16(Q, q_max.T) / jnp.sqrt(jnp.float32(NHID))
    A = jax.nn.softmax(A, axis=0)                  # [N, C]
    B = _mm_bf16(A.T, feats)                       # [C, ndim]  (V = feats)
    n_classes, ndim = c.shape[1], feats.shape[1]
    w2 = params["w_fcc"].reshape(n_classes, n_classes * ndim)
    logits = B.reshape(1, n_classes * ndim) @ w2.T + params["b_fcc"]
    return logits, A, B


if __name__ == "__main__":
    key = jax.random.PRNGKey(0)
    kx, kc, kp, kx2, kc2 = jax.random.split(key, 5)

    # Small bag: 8 instances x 32 features, 2 classes (single tile, ndim < 128).
    N, NDIM, NCLS = 8, 32, 2
    feats = jax.random.normal(kx, (N, NDIM), jnp.float32)
    c = jax.random.normal(kc, (N, NCLS), jnp.float32)
    params = init_params(kp, NDIM, NCLS)

    logits, A, B = bclassifier_forward(feats, c, params)
    jax.block_until_ready((logits, A, B))
    r_logits, r_A, r_B = bclassifier_reference(feats, c, params)
    assert logits.shape == (1, NCLS) and A.shape == (N, NCLS) and B.shape == (NCLS, NDIM)
    assert jnp.allclose(logits, r_logits, atol=3e-2, rtol=3e-2)
    assert jnp.allclose(A, r_A, atol=2e-2)
    assert jnp.allclose(B, r_B, atol=2e-2, rtol=2e-2)

    # Multi-tile bag: 300 instances with 128-row tiles -> exercises the online softmax
    # across tiles, the ragged last tile and the two-split flash merge.
    N2 = 300
    feats2 = jax.random.normal(kx2, (N2, NDIM), jnp.float32)
    c2 = jax.random.normal(kc2, (N2, NCLS), jnp.float32)
    out2 = bclassifier_forward(feats2, c2, params, tile_n=128)
    jax.block_until_ready(out2)
    ref2 = bclassifier_reference(feats2, c2, params)
    assert jnp.allclose(out2[0], ref2[0], atol=3e-2, rtol=3e-2)
    assert jnp.allclose(out2[1], ref2[1], atol=2e-2)
    assert jnp.allclose(out2[2], ref2[2], atol=2e-2, rtol=2e-2)

    # Bucketed padding + runtime bag length (no recompile per bag as long as the padded
    # static shape is reused): pad 300 -> 384 rows and pass n_valid=300.
    pad = 384 - N2
    feats3 = jnp.pad(feats2, ((0, pad), (0, 0)))
    c3 = jnp.pad(c2, ((0, pad), (0, 0)))
    out3 = bclassifier_forward(feats3, c3, params, n_valid=N2, tile_n=128)
    jax.block_until_ready(out3)
    assert jnp.allclose(out3[0], ref2[0], atol=3e-2, rtol=3e-2)
    assert jnp.allclose(out3[1][:N2], ref2[1], atol=2e-2)
    assert jnp.allclose(out3[2], ref2[2], atol=2e-2, rtol=2e-2)

    print("KERNEL_OK")
</pallas_src>

<mosaic_0001>
module attributes {stable_mosaic.version = 11 : i64} {
  func.func @_bag_kernel(%arg0: i32, %arg1: i32, %arg2: memref<1xi32, #tpu.memory_space<smem>>, %arg3: memref<128x32xf32, #tpu.memory_space<vmem>>, %arg4: memref<32x128xbf16, #tpu.memory_space<vmem>>, %arg5: memref<1x128xf32, #tpu.memory_space<vmem>>, %arg6: memref<128x128xbf16, #tpu.memory_space<vmem>>, %arg7: memref<1x128xf32, #tpu.memory_space<vmem>>, %arg8: memref<8x128xbf16, #tpu.memory_space<vmem>>, %arg9: memref<8x128xf32, #tpu.memory_space<vmem>>, %arg10: memref<1x8x32xf32, #tpu.memory_space<vmem>>, %arg11: memref<1x8x1xf32, #tpu.memory_space<vmem>>, %arg12: memref<1x8x1xf32, #tpu.memory_space<vmem>>, %arg13: memref<8x1xf32, #tpu.memory_space<vmem>>, %arg14: memref<8x1xf32, #tpu.memory_space<vmem>>, %arg15: memref<8x32xf32, #tpu.memory_space<vmem>>) attributes {dimension_semantics = [#tpu.dimension_semantics<parallel>, #tpu.dimension_semantics<arbitrary>], iteration_bounds = array<i64: 2, 1>, scalar_prefetch = 1 : i64, scratch_operands = 3 : i64, tpu.core_type = #tpu.core_type<tc>, window_params = [{transform_indices = @transform_0, window_bounds = array<i64: 128, 32>}, {pipeline_mode = #tpu.pipeline_mode<synchronous>, transform_indices = @transform_1, window_bounds = array<i64: 32, 128>}, {pipeline_mode = #tpu.pipeline_mode<synchronous>, transform_indices = @transform_2, window_bounds = array<i64: 1, 128>}, {pipeline_mode = #tpu.pipeline_mode<synchronous>, transform_indices = @transform_3, window_bounds = array<i64: 128, 128>}, {pipeline_mode = #tpu.pipeline_mode<synchronous>, transform_indices = @transform_4, window_bounds = array<i64: 1, 128>}, {pipeline_mode = #tpu.pipeline_mode<synchronous>, transform_indices = @transform_5, window_bounds = array<i64: 8, 128>}, {transform_indices = @transform_6, window_bounds = array<i64: 8, 128>}, {transform_indices = @transform_7, window_bounds = array<i64: 1, 8, 32>}, {transform_indices = @transform_8, window_bounds = array<i64: 1, 8, 1>}, {transform_indices = @transform_9, window_bounds = array<i64: 1, 8, 1>}]} {
    %c0_i32 = arith.constant 0 : i32
    %0 = arith.cmpi eq, %arg1, %c0_i32 : i32
    %1 = arith.extui %0 : i1 to i32
    %c0_i32_0 = arith.constant 0 : i32
    %2 = arith.cmpi ne, %1, %c0_i32_0 : i32
    scf.if %2 {
      %cst_38 = arith.constant -1.000000e+30 : f32
      %72 = vector.broadcast %cst_38 : f32 to vector<8x1xf32>
      %c0_39 = arith.constant 0 : index
      %c0_40 = arith.constant 0 : index
      %73 = vector.load %arg13[%c0_39, %c0_40] : memref<8x1xf32, #tpu.memory_space<vmem>>, vector<8x1xf32>
      tpu.vector_store %arg13[%c0_39, %c0_40], %72 {strides = array<i32>} : memref<8x1xf32, #tpu.memory_space<vmem>>, vector<8x1xf32>,
      %cst_41 = arith.constant 0.000000e+00 : f32
      %74 = vector.broadcast %cst_41 : f32 to vector<8x1xf32>
      %c0_42 = arith.constant 0 : index
      %c0_43 = arith.constant 0 : index
      %75 = vector.load %arg14[%c0_42, %c0_43] : memref<8x1xf32, #tpu.memory_space<vmem>>, vector<8x1xf32>
      tpu.vector_store %arg14[%c0_42, %c0_43], %74 {strides = array<i32>} : memref<8x1xf32, #tpu.memory_space<vmem>>, vector<8x1xf32>,
      %cst_44 = arith.constant 0.000000e+00 : f32
      %76 = vector.broadcast %cst_44 : f32 to vector<8x32xf32>
      %c0_45 = arith.constant 0 : index
      %c0_46 = arith.constant 0 : index
      %77 = vector.load %arg15[%c0_45, %c0_46] : memref<8x32xf32, #tpu.memory_space<vmem>>, vector<8x32xf32>
      tpu.vector_store %arg15[%c0_45, %c0_46], %76 {strides = array<i32>} : memref<8x32xf32, #tpu.memory_space<vmem>>, vector<8x32xf32>,
    } else {
    }
    %c0 = arith.constant 0 : index
    %3 = memref.load %arg2[%c0] : memref<1xi32, #tpu.memory_space<smem>>
    %c1_i32 = arith.constant 1 : i32
    %4 = arith.muli %arg0, %c1_i32 : i32
    %5 = arith.addi %4, %arg1 : i32
    %c128_i32 = arith.constant 128 : i32
    %6 = arith.muli %5, %c128_i32 : i32
    %7 = tpu.iota {dimensions = array<i32: 0>} : vector<128x1xi32>
    %8 = vector.broadcast %6 : i32 to vector<128x1xi32>
    %9 = arith.addi %8, %7 : vector<128x1xi32>
    %10 = vector.broadcast %3 : i32 to vector<128x1xi32>
    %11 = arith.cmpi slt, %9, %10 : vector<128x1xi32>
    %c0_1 = arith.constant 0 : index
    %c0_2 = arith.constant 0 : index
    %12 = vector.load %arg3[%c0_1, %c0_2] : memref<128x32xf32, #tpu.memory_space<vmem>>, vector<128x32xf32>
    %c0_i32_3 = arith.constant 0 : i32
    %13 = arith.sitofp %c0_i32_3 : i32 to f32
    %14 = vector.shape_cast %11 : vector<128x1xi1> to vector<128x1xi1>
    %15 = vector.broadcast %14 : vector<128x1xi1> to vector<128x32xi1>
    %16 = vector.broadcast %13 : f32 to vector<128x32xf32>
    %17 = arith.select %15, %12, %16 : vector<128x32xi1>, vector<128x32xf32>
    %18 = arith.truncf %17 : vector<128x32xf32> to vector<128x32xbf16>
    %c0_4 = arith.constant 0 : index
    %c0_5 = arith.constant 0 : index
    %19 = vector.load %arg4[%c0_4, %c0_5] : memref<32x128xbf16, #tpu.memory_space<vmem>>, vector<32x128xbf16>
    %cst = arith.constant dense<0.000000e+00> : vector<128x128xf32>
    %20 = tpu.matmul %18, %19, %cst {dimension_numbers = #tpu.dot_dimension_numbers<[1], [0], [0], [1], [0, 0, 1, 1], [], []>} : vector<128x32xbf16>, vector<32x128xbf16>, vector<128x128xf32> -> vector<128x128xf32>
    %c0_6 = arith.constant 0 : index
    %c0_7 = arith.constant 0 : index
    %21 = vector.load %arg5[%c0_6, %c0_7] : memref<1x128xf32, #tpu.memory_space<vmem>>, vector<1x128xf32>
    %22 = vector.broadcast %21 : vector<1x128xf32> to vector<128x128xf32>
    %23 = arith.addf %20, %22 : vector<128x128xf32>
    %cst_8 = arith.constant 0.000000e+00 : f32
    %24 = vector.broadcast %cst_8 : f32 to vector<128x128xf32>
    %25 = arith.maximumf %23, %24 : vector<128x128xf32>
    %26 = arith.truncf %25 : vector<128x128xf32> to vector<128x128xbf16>
    %c0_9 = arith.constant 0 : index
    %c0_10 = arith.constant 0 : index
    %27 = vector.load %arg6[%c0_9, %c0_10] : memref<128x128xbf16, #tpu.memory_space<vmem>>, vector<128x128xbf16>
    %cst_11 = arith.constant dense<0.000000e+00> : vector<128x128xf32>
    %28 = tpu.matmul %26, %27, %cst_11 {dimension_numbers = #tpu.dot_dimension_numbers<[1], [0], [0], [1], [0, 0, 1, 1], [], []>} : vector<128x128xbf16>, vector<128x128xbf16>, vector<128x128xf32> -> vector<128x128xf32>
    %c0_12 = arith.constant 0 : index
    %c0_13 = arith.constant 0 : index
    %29 = vector.load %arg7[%c0_12, %c0_13] : memref<1x128xf32, #tpu.memory_space<vmem>>, vector<1x128xf32>
    %30 = vector.broadcast %29 : vector<1x128xf32> to vector<128x128xf32>
    %31 = arith.addf %28, %30 : vector<128x128xf32>
    %32 = math.tanh %31 : vector<128x128xf32>
    %c0_14 = arith.constant 0 : index
    %c0_15 = arith.constant 0 : index
    %33 = vector.load %arg8[%c0_14, %c0_15] : memref<8x128xbf16, #tpu.memory_space<vmem>>, vector<8x128xbf16>
    %34 = arith.truncf %32 : vector<128x128xf32> to vector<128x128xbf16>
    %cst_16 = arith.constant dense<0.000000e+00> : vector<8x128xf32>
    %35 = tpu.matmul %33, %34, %cst_16 {dimension_numbers = #tpu.dot_dimension_numbers<[1], [1], [0], [0], [0, 0, 1, 0], [], []>} : vector<8x128xbf16>, vector<128x128xbf16>, vector<8x128xf32> -> vector<8x128xf32>
    %cst_17 = arith.constant 0.0883883461 : f32
    %36 = vector.broadcast %cst_17 : f32 to vector<8x128xf32>
    %37 = arith.mulf %35, %36 : vector<8x128xf32>
    %38 = tpu.iota {dimensions = array<i32: 1>} : vector<8x128xi32>
    %39 = vector.broadcast %6 : i32 to vector<8x128xi32>
    %40 = arith.addi %39, %38 : vector<8x128xi32>
    %41 = vector.broadcast %3 : i32 to vector<8x128xi32>
    %42 = arith.cmpi slt, %40, %41 : vector<8x128xi32>
    %cst_18 = arith.constant -1.000000e+30 : f32
    %43 = vector.broadcast %cst_18 : f32 to vector<8x128xf32>
    %44 = arith.select %42, %37, %43 : vector<8x128xi1>, vector<8x128xf32>
    %c0_19 = arith.constant 0 : index
    %c0_20 = arith.constant 0 : index
    %45 = vector.load %arg9[%c0_19, %c0_20] : memref<8x128xf32, #tpu.memory_space<vmem>>, vector<8x128xf32>
    tpu.vector_store %arg9[%c0_19, %c0_20], %44 {strides = array<i32>} : memref<8x128xf32, #tpu.memory_space<vmem>>, vector<8x128xf32>,
    %c0_21 = arith.constant 0 : index
    %c0_22 = arith.constant 0 : index
    %46 = vector.load %arg13[%c0_21, %c0_22] : memref<8x1xf32, #tpu.memory_space<vmem>>, vector<8x1xf32>
    %cst_23 = arith.constant dense<0xFF800000> : vector<8xf32>
    %47 = vector.multi_reduction <maximumf>, %44, %cst_23 [1] : vector<8x128xf32> to vector<8xf32>
    %48 = vector.shape_cast %47 : vector<8xf32> to vector<8x1xf32>
    %49 = arith.maximumf %46, %48 : vector<8x1xf32>
    %50 = arith.subf %46, %49 : vector<8x1xf32>
    %51 = math.exp %50 : vector<8x1xf32>
    %52 = vector.broadcast %49 : vector<8x1xf32> to vector<8x128xf32>
    %53 = arith.subf %44, %52 : vector<8x128xf32>
    %54 = math.exp %53 : vector<8x128xf32>
    %c0_24 = arith.constant 0 : index
    %c0_25 = arith.constant 0 : index
    %55 = vector.load %arg14[%c0_24, %c0_25] : memref<8x1xf32, #tpu.memory_space<vmem>>, vector<8x1xf32>
    %56 = arith.mulf %51, %55 : vector<8x1xf32>
    %cst_26 = arith.constant dense<0.000000e+00> : vector<8xf32>
    %57 = vector.multi_reduction <add>, %54, %cst_26 [1] : vector<8x128xf32> to vector<8xf32>
    %58 = vector.shape_cast %57 : vector<8xf32> to vector<8x1xf32>
    %59 = arith.addf %56, %58 : vector<8x1xf32>
    %c0_27 = arith.constant 0 : index
    %c0_28 = arith.constant 0 : index
    %60 = vector.load %arg14[%c0_27, %c0_28] : memref<8x1xf32, #tpu.memory_space<vmem>>, vector<8x1xf32>
    tpu.vector_store %arg14[%c0_27, %c0_28], %59 {strides = array<i32>} : memref<8x1xf32, #tpu.memory_space<vmem>>, vector<8x1xf32>,
    %c0_29 = arith.constant 0 : index
    %c0_30 = arith.constant 0 : index
    %61 = vector.load %arg15[%c0_29, %c0_30] : memref<8x32xf32, #tpu.memory_space<vmem>>, vector<8x32xf32>
    %62 = vector.broadcast %51 : vector<8x1xf32> to vector<8x32xf32>
    %63 = arith.mulf %62, %61 : vector<8x32xf32>
    %64 = arith.truncf %54 : vector<8x128xf32> to vector<8x128xbf16>
    %cst_31 = arith.constant dense<0.000000e+00> : vector<8x32xf32>
    %65 = tpu.matmul %64, %18, %cst_31 {dimension_numbers = #tpu.dot_dimension_numbers<[1], [0], [0], [1], [0, 0, 1, 1], [], []>} : vector<8x128xbf16>, vector<128x32xbf16>, vector<8x32xf32> -> vector<8x32xf32>
    %66 = arith.addf %63, %65 : vector<8x32xf32>
    %c0_32 = arith.constant 0 : index
    %c0_33 = arith.constant 0 : index
    %67 = vector.load %arg15[%c0_32, %c0_33] : memref<8x32xf32, #tpu.memory_space<vmem>>, vector<8x32xf32>
    tpu.vector_store %arg15[%c0_32, %c0_33], %66 {strides = array<i32>} : memref<8x32xf32, #tpu.memory_space<vmem>>, vector<8x32xf32>,
    %c0_34 = arith.constant 0 : index
    %c0_35 = arith.constant 0 : index
    %68 = vector.load %arg13[%c0_34, %c0_35] : memref<8x1xf32, #tpu.memory_space<vmem>>, vector<8x1xf32>
    tpu.vector_store %arg13[%c0_34, %c0_35], %49 {strides = array<i32>} : memref<8x1xf32, #tpu.memory_space<vmem>>, vector<8x1xf32>,
    %c0_i32_36 = arith.constant 0 : i32
    %69 = arith.cmpi eq, %arg1, %c0_i32_36 : i32
    %70 = arith.extui %69 : i1 to i32
    %c0_i32_37 = arith.constant 0 : i32
    %71 = arith.cmpi ne, %70, %c0_i32_37 : i32
    scf.if %71 {
      %c0_38 = arith.constant 0 : index
      %c0_39 = arith.constant 0 : index
      %72 = vector.load %arg15[%c0_38, %c0_39] : memref<8x32xf32, #tpu.memory_space<vmem>>, vector<8x32xf32>
      %c0_40 = arith.constant 0 : index
      %c0_41 = arith.constant 0 : index
      %c0_42 = arith.constant 0 : index
      %73 = vector.load %arg10[%c0_40, %c0_41, %c0_42] : memref<1x8x32xf32, #tpu.memory_space<vmem>>, vector<1x8x32xf32>
      %74 = vector.shape_cast %73 : vector<1x8x32xf32> to vector<8x32xf32>
      %75 = vector.shape_cast %72 : vector<8x32xf32> to vector<1x8x32xf32>
      tpu.vector_store %arg10[%c0_40, %c0_41, %c0_42], %75 {strides = array<i32>} : memref<1x8x32xf32, #tpu.memory_space<vmem>>, vector<1x8x32xf32>,
      %c0_43 = arith.constant 0 : index
      %c0_44 = arith.constant 0 : index
      %76 = vector.load %arg13[%c0_43, %c0_44] : memref<8x1xf32, #tpu.memory_space<vmem>>, vector<8x1xf32>
      %c0_45 = arith.constant 0 : index
      %c0_46 = arith.constant 0 : index
      %c0_47 = arith.constant 0 : index
      %77 = vector.load %arg11[%c0_45, %c0_46, %c0_47] : memref<1x8x1xf32, #tpu.memory_space<vmem>>, vector<1x8x1xf32>
      %78 = vector.shape_cast %77 : vector<1x8x1xf32> to vector<8x1xf32>
      %79 = vector.shape_cast %76 : vector<8x1xf32> to vector<1x8x1xf32>
      tpu.vector_store %arg11[%c0_45, %c0_46, %c0_47], %79 {strides = array<i32>} : memref<1x8x1xf32, #tpu.memory_space<vmem>>, vector<1x8x1xf32>,
      %c0_48 = arith.constant 0 : index
      %c0_49 = arith.constant 0 : index
      %80 = vector.load %arg14[%c0_48, %c0_49] : memref<8x1xf32, #tpu.memory_space<vmem>>, vector<8x1xf32>
      %c0_50 = arith.constant 0 : index
      %c0_51 = arith.constant 0 : index
      %c0_52 = arith.constant 0 : index
      %81 = vector.load %arg12[%c0_50, %c0_51, %c0_52] : memref<1x8x1xf32, #tpu.memory_space<vmem>>, vector<1x8x1xf32>
      %82 = vector.shape_cast %81 : vector<1x8x1xf32> to vector<8x1xf32>
      %83 = vector.shape_cast %80 : vector<8x1xf32> to vector<1x8x1xf32>
      tpu.vector_store %arg12[%c0_50, %c0_51, %c0_52], %83 {strides = array<i32>} : memref<1x8x1xf32, #tpu.memory_space<vmem>>, vector<1x8x1xf32>,
    } else {
    }
    return
  }
  func.func @transform_0(%arg0: i32, %arg1: i32, %arg2: memref<1xi32, #tpu.memory_space<smem>>) -> (i32, i32) {
    %c1_i32 = arith.constant 1 : i32
    %0 = arith.muli %arg0, %c1_i32 : i32
    %1 = arith.addi %0, %arg1 : i32
    %c0_i32 = arith.constant 0 : i32
    %2 = arith.minsi %1, %c0_i32 : i32
    %c0_i32_0 = arith.constant 0 : i32
    %c0_i32_1 = arith.constant 0 : i32
    return %2, %c0_i32_0 : i32, i32
  }
  func.func @transform_1(%arg0: i32, %arg1: i32, %arg2: memref<1xi32, #tpu.memory_space<smem>>) -> (i32, i32) {
    %c0_i32 = arith.constant 0 : i32
    %c0_i32_0 = arith.constant 0 : i32
    %c0_i32_1 = arith.constant 0 : i32
    return %c0_i32, %c0_i32_0 : i32, i32
  }
  func.func @transform_2(%arg0: i32, %arg1: i32, %arg2: memref<1xi32, #tpu.memory_space<smem>>) -> (i32, i32) {
    %c0_i32 = arith.constant 0 : i32
    %c0_i32_0 = arith.constant 0 : i32
    %c0_i32_1 = arith.constant 0 : i32
    return %c0_i32, %c0_i32_0 : i32, i32
  }
  func.func @transform_3(%arg0: i32, %arg1: i32, %arg2: memref<1xi32, #tpu.memory_space<smem>>) -> (i32, i32) {
    %c0_i32 = arith.constant 0 : i32
    %c0_i32_0 = arith.constant 0 : i32
    %c0_i32_1 = arith.constant 0 : i32
    return %c0_i32, %c0_i32_0 : i32, i32
  }
  func.func @transform_4(%arg0: i32, %arg1: i32, %arg2: memref<1xi32, #tpu.memory_space<smem>>) -> (i32, i32) {
    %c0_i32 = arith.constant 0 : i32
    %c0_i32_0 = arith.constant 0 : i32
    %c0_i32_1 = arith.constant 0 : i32
    return %c0_i32, %c0_i32_0 : i32, i32
  }
  func.func @transform_5(%arg0: i32, %arg1: i32, %arg2: memref<1xi32, #tpu.memory_space<smem>>) -> (i32, i32) {
    %c0_i32 = arith.constant 0 : i32
    %c0_i32_0 = arith.constant 0 : i32
    %c0_i32_1 = arith.constant 0 : i32
    return %c0_i32, %c0_i32_0 : i32, i32
  }
  func.func @transform_6(%arg0: i32, %arg1: i32, %arg2: memref<1xi32, #tpu.memory_space<smem>>) -> (i32, i32) {
    %c1_i32 = arith.constant 1 : i32
    %0 = arith.muli %arg0, %c1_i32 : i32
    %1 = arith.addi %0, %arg1 : i32
    %c0_i32 = arith.constant 0 : i32
    %c0_i32_0 = arith.constant 0 : i32
    return %c0_i32, %1 : i32, i32
  }
  func.func @transform_7(%arg0: i32, %arg1: i32, %arg2: memref<1xi32, #tpu.memory_space<smem>>) -> (i32, i32, i32) {
    %c0_i32 = arith.constant 0 : i32
    %c0_i32_0 = arith.constant 0 : i32
    %c0_i32_1 = arith.constant 0 : i32
    return %arg0, %c0_i32, %c0_i32_0 : i32, i32, i32
  }
  func.func @transform_8(%arg0: i32, %arg1: i32, %arg2: memref<1xi32, #tpu.memory_space<smem>>) -> (i32, i32, i32) {
    %c0_i32 = arith.constant 0 : i32
    %c0_i32_0 = arith.constant 0 : i32
    %c0_i32_1 = arith.constant 0 : i32
    return %arg0, %c0_i32, %c0_i32_0 : i32, i32, i32
  }
  func.func @transform_9(%arg0: i32, %arg1: i32, %arg2: memref<1xi32, #tpu.memory_space<smem>>) -> (i32, i32, i32) {
    %c0_i32 = arith.constant 0 : i32
    %c0_i32_0 = arith.constant 0 : i32
    %c0_i32_1 = arith.constant 0 : i32
    return %arg0, %c0_i32, %c0_i32_0 : i32, i32, i32
  }
}

</mosaic_0001>

<bundles_post_ra>
// kernel: bclassifier_forward.1
= control target key start
LH: loop header
LB: loop body
LE: loop exit
PB: predicated region body
PF: predicated region fallthrough
CT: control target
= control target key end

     0   :  { %s1555_s15 = smov 0   ;;  %s1557_s16 = smov 0   ;;  %s1991_s0 = inlined_call_operand.<no memory space> [shape: s32[1], index: 0, kind: input, shape index: {}]   ;;  %s1992_s1 = inlined_call_operand.vmem [shape: f32[8,32], index: 1, kind: input, shape index: {}]   ;;  %s1993_s2 = inlined_call_operand.vmem [shape: bf16[32,128], index: 2, kind: input, shape index: {}]   ;;  %s1994_s3 = inlined_call_operand.vmem [shape: f32[1,128], index: 3, kind: input, shape index: {}]   ;;  %s1995_s4 = inlined_call_operand.vmem [shape: bf16[128,128], index: 4, kind: input, shape index: {}]   ;;  %s1996_s5 = inlined_call_operand.vmem [shape: f32[1,128], index: 5, kind: input, shape index: {}]   ;;  %s1997_s6 = inlined_call_operand.vmem [shape: bf16[8,128], index: 6, kind: input, shape index: {}]   ;;  %s1998_s7 = inlined_call_operand.vmem [shape: f32[8,256], index: 7, kind: output, shape index: {0}]   ;;  %s1999_s8 = inlined_call_operand.vmem [shape: f32[2,8,32], index: 8, kind: output, shape index: {1}]   ;;  %s2000_s9 = inlined_call_operand.vmem [shape: f32[2,8,1], index: 9, kind: output, shape index: {2}]   ;;  %s2001_s10 = inlined_call_operand.vmem [shape: f32[2,8,1], index: 10, kind: output, shape index: {3}]  }
   0x1   :  { %16 = sst [smem:[#allocation6]] %s1991_s0  ;;  %s1559_s17 = smov 0  }
   0x2 LB: > { %s34_s0 = sadd.s32 1, %s1487_s16  ;;  %p1203_p0 = scmp.ge.s32.totalorder %s1491_s17, 1  ;;  %s1491_s17 = sphi %s1559_s17, %s22_s17   ;;  %s1487_s16 = sphi %s1557_s16, %s2012_s16   ;;  %s1483_s15 = sphi %s1555_s15, %s2011_s15  }
   0x3   : > { %p36_p1 = scmp.ge.s32.totalorder %s34_s0, 2  ;;  %p327_p2 = scmp.lt.s32.totalorder %s1491_s17, 3 }
   0x5   : > { %s2014_s0 = smov (%p36_p1, %s34_s0), 0  ;;  %p328_p3 = pnand %p1203_p0, %p327_p2 }
   0x6   : > { %v1423_v0 = vld [vmem:[%s1993_s2] sm:$0xff] (!%p328_p3)   ;;  %p381_p4 = scmp.lt.s32.totalorder (!%p328_p3), %s1483_s15, 0  ;;  %v427_v1 = vlaneseq (!%p328_p3)  ;;  %v1424_v2 = vld [vmem:[%s1993_s2 + $0x8] sm:$0xff] (!%p328_p3)   ;;  %s1586_s23 = sld [smem:[#allocation6]] (!%p328_p3)  ;;  %v1427_v18 = vld [vmem:[%s1995_s4 + $0x10] sm:$0xff] (!%p328_p3)   ;;  %vm2003_vm0 = vcmask (!%p328_p3), 261120  }
   0x7   : > { %331 = sbr.rel (%p328_p3) target bundleno = 1269 (0x4f5), region = 44  ;;  %1301 = vmatprep.subr.bf16.mxu0 (!%p328_p3), %v1423_v0  ;;  %s1210_s24 = sshll.u32 (!%p328_p3), %s1483_s15, 7  ;;  %v1425_v4 = vld [vmem:[%s1995_s4] sm:$0xff] (!%p328_p3)   ;;  %v1426_v13 = vld [vmem:[%s1995_s4 + $0x8] sm:$0xff] (!%p328_p3)   ;;  %v1428_v29 = vld [vmem:[%s1995_s4 + $0x18] sm:$0xff] (!%p328_p3)  }
   0x8   : > { %v1584_v3 = vshrl.u32 (!%p328_p3), %v427_v1, 7  ;;  %1302 = vmatpush3.bf16.msra.mxu0 (!%p328_p3), %v1423_v0  ;;  %v1593_v6 = vstv (!%p328_p3), %s1210_s24  ;;  %1321 = vmatprep.subr.bf16.mxu1 (!%p328_p3), %v1425_v4  ;;  %v1429_v57 = vld [vmem:[%s1995_s4 + $0x20] sm:$0xff] (!%p328_p3)   ;;  %p397_p6 = scmp.lt.s32.totalorder (!%p328_p3), %s1483_s15, 1 }
   0x9   : > { %1303 = vmatprep.subr.bf16.mxu0 (!%p328_p3), %v1424_v2  ;;  %1322 = vmatpush3.bf16.msra.mxu1 (!%p328_p3), %v1425_v4 }
   0xa   : > { %v429_v5 = vadd.s32 (!%p328_p3), 8, %v1584_v3  ;;  %v430_v7 = vadd.s32 (!%p328_p3), 16, %v1584_v3  ;;  %v431_v8 = vadd.s32 (!%p328_p3), 24, %v1584_v3  ;;  %v445_v9 = vadd.s32 (!%p328_p3), %v1593_v6, %v1584_v3  ;;  %1323 = vmatprep.subr.bf16.mxu1 (!%p328_p3), %v1426_v13 }
   0xb   : > { %v432_v10 = vadd.s32 (!%p328_p3), 32, %v1584_v3  ;;  %v433_v11 = vadd.s32 (!%p328_p3), 40, %v1584_v3  ;;  %v434_v12 = vadd.s32 (!%p328_p3), 48, %v1584_v3  ;;  %v435_v17 = vadd.s32 (!%p328_p3), 56, %v1584_v3 }
   0xc   : > { %v446_v14 = vadd.s32 (!%p328_p3), %v1593_v6, %v429_v5  ;;  %v1611_v15 = vadd.s32 (!%p328_p3), %v1593_v6, %v430_v7  ;;  %v1614_v16 = vadd.s32 (!%p328_p3), %v1593_v6, %v431_v8  ;;  %1304 = vmatpush3.bf16.msra.mxu0 (!%p328_p3), %v1424_v2  ;;  %v436_v22 = vadd.s32 (!%p328_p3), 64, %v1584_v3 }
   0xd   : > { %v1623_v19 = vadd.s32 (!%p328_p3), %v1593_v6, %v432_v10  ;;  %v1626_v20 = vadd.s32 (!%p328_p3), %v1593_v6, %v433_v11  ;;  %v1629_v21 = vadd.s32 (!%p328_p3), %v1593_v6, %v434_v12  ;;  %v1633_v23 = vadd.s32 (!%p328_p3), %v1593_v6, %v435_v17  ;;  %1324 = vmatpush3.bf16.msra.mxu1 (!%p328_p3), %v1426_v13  ;;  %v1430_v12 = vld [vmem:[%s1995_s4 + $0x28] sm:$0xff] (!%p328_p3)  }
   0xe   : > { %s382_s22 = scalar_select %p381_p4, %s1483_s15, 0  ;;  %v437_v24 = vadd.s32 72, %v1584_v3  ;;  %v1637_v25 = vstv %s1586_s23  ;;  %v1640_v26 = vadd.s32 %v1593_v6, %v436_v22  ;;  %v438_v27 = vadd.s32 80, %v1584_v3  ;;  %1325 = vmatprep.subr.bf16.mxu1 %v1427_v18 }
   0xf   : > { %v439_v28 = vadd.s32 88, %v1584_v3  ;;  %vm462_vm1 = vcmp.lt.s32.totalorder %v445_v9, %v1637_v25  ;;  %vm463_vm2 = vcmp.lt.s32.totalorder %v446_v14, %v1637_v25  ;;  %vm464_vm3 = vcmp.lt.s32.totalorder %v1611_v15, %v1637_v25  ;;  %s2018_s15 = smov (!%p397_p6, %s1483_s15), 1 }
  0x10   : > { %s1204_s27 = sshll.u32 %s382_s22, 4  ;;  %vm465_vm4 = vcmp.lt.s32.totalorder %v1614_v16, %v1637_v25  ;;  %vm1664_vm5 = vmpackc.low %vm463_vm2, %vm462_vm1  ;;  %vm466_vm6 = vcmp.lt.s32.totalorder %v1623_v19, %v1637_v25  ;;  %vm467_vm7 = vcmp.lt.s32.totalorder %v1626_v20, %v1637_v25  ;;  %vm468_vm8 = vcmp.lt.s32.totalorder %v1629_v21, %v1637_v25  ;;  %s1888_s19 = sshll.u32 %s2018_s15, 3 }
  0x11   : > { %p1597_p5 = scmp.lt.s32.totalorder %s1204_s27, 0  ;;  %vm469_vm9 = vcmp.lt.s32.totalorder %v1633_v23, %v1637_v25  ;;  %v1690_v39 = vadd.s32 %v1593_v6, %v437_v24  ;;  %1326 = vmatpush3.bf16.msra.mxu1 %v1427_v18  ;;  %v440_v55 = vadd.s32 96, %v1584_v3  ;;  %v441_v56 = vadd.s32 104, %v1584_v3  ;;  %s400_s22 = scalar_lea.vmem %s1998_s7, %s1888_s19 }
  0x12   : > { %1327 = vmatprep.subr.bf16.mxu1 %v1428_v29  ;;  %vm470_vm10 = vcmp.lt.s32.totalorder %v1640_v26, %v1637_v25  ;;  %v1755_v62 = vadd.s32 %v1593_v6, %v438_v27  ;;  %v1769_v4 = vadd.s32 %v1593_v6, %v439_v28  ;;  %v442_v22 = vadd.s32 112, %v1584_v3  ;;  %s409_s24 = scalar_lea.vmem %s2000_s9, %s1888_s19  ;;  %s405_s30 = scalar_lea.vmem %s1999_s8, %s1888_s19 }
  0x13   : > { %s2016_s27 = smov (!%p1597_p5, %s1204_s27), 0  ;;  %vm471_vm11 = vcmp.lt.s32.totalorder %v1690_v39, %v1637_v25  ;;  %v1780_v9 = vadd.s32 %v1593_v6, %v440_v55  ;;  %v1783_v10 = vadd.s32 %v1593_v6, %v441_v56  ;;  %v443_v24 = vadd.s32 120, %v1584_v3  ;;  %v1432_v55 = vld [vmem:[%s1995_s4 + $0x38] sm:$0xff]   ;;  %v1211_v56 = vld [vmem:[%s1994_s3] ss:$0 sm:$0xff] }
  0x14   : > { %s1205_s13 = sshll.u32 %s2016_s27, 3  ;;  %vm472_vm12 = vcmp.lt.s32.totalorder %v1755_v62, %v1637_v25  ;;  %vm473_vm13 = vcmp.lt.s32.totalorder %v1769_v4, %v1637_v25  ;;  %s413_s27 = scalar_lea.vmem %s2001_s10, %s1888_s19 }
  0x15   : > { %s1650_s21 = scalar_lea.vmem %s1992_s1, %s1205_s13  ;;  %1328 = vmatpush3.bf16.msra.mxu1 %v1428_v29  ;;  %vm474_vm14 = vcmp.lt.s32.totalorder %v1780_v9, %v1637_v25  ;;  %vm475_vm15 = vcmp.lt.s32.totalorder %v1783_v10, %v1637_v25 }
  0x16   : > { %v1659_v30 = vld [vmem:[%s1650_s21] sm:$0xff]  ;;  %v1662_v31 = vld [vmem:[%s1650_s21 + $0x8] sm:$0xff]  ;;  %v1681_v36 = vld [vmem:[%s1650_s21 + $0x10] sm:$0xff]  ;;  %1329 = vmatprep.subr.bf16.mxu1 %v1429_v57 }
  0x17   : > { %v526_v33 = vsel %vm462_vm1, %v1659_v30, 0.0  ;;  %v527_v34 = vsel %vm463_vm2, %v1662_v31, 0.0  ;;  %v1232_v35 = vpack.c.bf16 %v1662_v31, %v1659_v30  ;;  %v1684_v37 = vld [vmem:[%s1650_s21 + $0x18] sm:$0xff]  ;;  %v1687_v38 = vld [vmem:[%s1650_s21 + $0x20] sm:$0xff]  ;;  %v528_v41 = vsel %vm464_vm3, %v1681_v36, 0.0  ;;  %v1703_v44 = vld [vmem:[%s1650_s21 + $0x28] sm:$0xff] }
  0x18   : > { %v542_v40 = vpack.c.bf16 %v527_v34, %v526_v33  ;;  %v529_v42 = vsel %vm465_vm4, %v1684_v37, 0.0  ;;  %v1235_v43 = vpack.c.bf16 %v1684_v37, %v1681_v36  ;;  %v1706_v45 = vld [vmem:[%s1650_s21 + $0x30] sm:$0xff]  ;;  %v530_v47 = vsel %vm466_vm6, %v1687_v38, 0.0  ;;  %v1719_v50 = vld [vmem:[%s1650_s21 + $0x38] sm:$0xff]  ;;  %v1725_v53 = vld [vmem:[%s1650_s21 + $0x40] sm:$0xff] }
  0x19   : > { %v543_v46 = vpack.c.bf16 %v529_v42, %v528_v41  ;;  %v531_v48 = vsel %vm467_vm7, %v1703_v44, 0.0  ;;  %v1238_v49 = vpack.c.bf16 %v1703_v44, %v1687_v38  ;;  %v1241_v52 = vpack.c.bf16 %v1719_v50, %v1706_v45  ;;  %v1728_v54 = vld [vmem:[%s1650_s21 + $0x48] sm:$0xff]  ;;  %v1747_v60 = vld [vmem:[%s1650_s21 + $0x50] sm:$0xff]  ;;  %v1758_v63 = vld [vmem:[%s1650_s21 + $0x58] sm:$0xff]  ;;  %1330 = vmatpush3.bf16.msra.mxu1 %v1429_v57 }
  0x1a   : > { %1305 = vmatprep.mubr.msk.bf16.mxu0 %vm2003_vm0, %v542_v40  ;;  %v544_v51 = vpack.c.bf16 %v531_v48, %v530_v47  ;;  %v532_v58 = vsel %vm468_vm8, %v1706_v45, 0.0  ;;  %v1244_v59 = vpack.c.bf16 %v1728_v54, %v1725_v53  ;;  %v533_v61 = vsel %vm469_vm9, %v1719_v50, 0.0  ;;  %v1774_v7 = vld [vmem:[%s1650_s21 + $0x60] sm:$0xff]  ;;  %v1777_v8 = vld [vmem:[%s1650_s21 + $0x68] sm:$0xff]  ;;  %v1793_v17 = vld [vmem:[%s1650_s21 + $0x70] sm:$0xff]  ;;  %1331 = vmatprep.subr.bf16.mxu1 %v1430_v12 }
  0x1b   : > { %1306 = vmatmul.mubr.msk.bf16.vlgmr.msra.gmra.mrb[0].mxu0 %vm2003_vm0, %v543_v46  ;;  %v534_v0 = vsel %vm470_vm10, %v1725_v53, 0.0  ;;  %v535_v2 = vsel %vm471_vm11, %v1728_v54, 0.0  ;;  %v1247_v5 = vpack.c.bf16 %v1758_v63, %v1747_v60  ;;  %v1250_v11 = vpack.c.bf16 %v1777_v8, %v1774_v7  ;;  %v1796_v18 = vld [vmem:[%s1650_s21 + $0x78] sm:$0xff] }
  0x1c   : > { %1309 = vmatprep.mubr.msk.bf16.mxu0 %vm2003_vm0, %v544_v51  ;;  %v545_v13 = vpack.c.bf16 %v533_v61, %v532_v58  ;;  %v546_v14 = vpack.c.bf16 %v535_v2, %v534_v0  ;;  %v536_v3 = vsel %vm472_vm12, %v1747_v60, 0.0  ;;  %v537_v28 = vsel %vm473_vm13, %v1758_v63, 0.0  ;;  %v1431_v51 = vld [vmem:[%s1995_s4 + $0x30] sm:$0xff]  }
  0x1d   : > { %v538_v29 = vsel %vm474_vm14, %v1774_v7, 0.0  ;;  %v539_v33 = vsel %vm475_vm15, %v1777_v8, 0.0  ;;  %v1827_v34 = vadd.s32 %v1593_v6, %v442_v22  ;;  %v1830_v40 = vadd.s32 %v1593_v6, %v443_v24  ;;  %1332 = vmatpush3.bf16.msra.mxu1 %v1430_v12 }
  0x1e   : > { %v547_v41 = vpack.c.bf16 %v537_v28, %v536_v3  ;;  %v548_v42 = vpack.c.bf16 %v539_v33, %v538_v29  ;;  %1333 = vmatprep.subr.bf16.mxu1 %v1431_v51  ;;  %v2008_v21 = vpack.c.bf16 %v1796_v18, %v1793_v17 }
  0x1f   : > { %vm476_vm1 = vcmp.lt.s32.totalorder %v1827_v34, %v1637_v25  ;;  %vm2002_vm2 = vcmp.lt.s32.totalorder %v1830_v40, %v1637_v25 }
  0x20   : > { %v540_v46 = vsel %vm476_vm1, %v1793_v17, 0.0  ;;  %v541_v47 = vsel %vm2002_vm2, %v1796_v18, 0.0  ;;  %vm1494_vm2 = vmmov 0  }
  0x21   : > { %v549_v48 = vpack.c.bf16 %v541_v47, %v540_v46  ;;  %1334 = vmatpush3.bf16.msra.mxu1 %v1431_v51 }
  0x22   : > { %1335 = vmatprep.subr.bf16.mxu1 %v1432_v55 }
  0x23   : > { %1310 = vmatmul.mubr.msk.bf16.gmra.mrb[4].mxu0 %vm2003_vm0, %v545_v13 }
  0x24   : > { %1313 = vmatprep.mubr.msk.bf16.mxu0 %vm2003_vm0, %v546_v14 }
  0x25   : > { %1336 = vmatpush3.bf16.msra.mxu1 %v1432_v55 }
  0x2b   : > { %1314 = vmatmul.mubr.msk.bf16.gmra.mrb[8].mxu0 %vm2003_vm0, %v547_v41 }
  0x2c   : > { %1317 = vmatprep.mubr.msk.bf16.mxu0 %vm2003_vm0, %v548_v42 }
  0x33   : > { %1318 = vmatmul.mubr.msk.bf16.gmra.mrb[12].mxu0 %vm2003_vm0, %v549_v48 }
  0xee   : > { %v1307_v57 = vpop.f32.mrb[0].mxu0 }
  0xef   : > { %v641_v58 = vadd.f32 %v1307_v57, %v1211_v56  ;;  %v632_v61 = vpop.f32.mrb[1].mxu0 }
  0xf0   : > { %v633_v0 = vadd.f32 %v1211_v56, %v632_v61  ;;  %v1308_v2 = vpop.f32.mrb[2].mxu0 }
  0xf1   : > { %v644_v12 = vadd.f32 %v1308_v2, %v1211_v56  ;;  %v635_v13 = vpop.f32.mrb[3].mxu0  ;;  %v697_v22 = vmax.f32 %v641_v58, 0.0 }
  0xf2   : > { %v636_v14 = vadd.f32 %v1211_v56, %v635_v13  ;;  %v695_v3 = vmax.f32 %v633_v0, 0.0 }
  0xf3   : > { %v698_v24 = vmax.f32 %v644_v12, 0.0 }
  0xf4   : > { %v696_v28 = vmax.f32 %v636_v14, 0.0 }
  0xf5   : > { %v712_v29 = vpack.c.bf16 %v698_v24, %v697_v22 }
  0xf6   : > { %v1311_v33 = vpop.f32.mrb[4].mxu0  ;;  %v711_v41 = vpack.c.bf16 %v696_v28, %v695_v3 }
  0xf7   : > { %v657_v42 = vadd.f32 %v1311_v33, %v1211_v56  ;;  %v648_v46 = vpop.f32.mrb[5].mxu0 }
  0xf8   : > { %v649_v47 = vadd.f32 %v1211_v56, %v648_v46  ;;  %1337 = vmatprep.mubr.bf16.mxu1 %v711_v41  ;;  %v1312_v48 = vpop.f32.mrb[6].mxu0 }
  0xf9   : > { %v701_v51 = vmax.f32 %v657_v42, 0.0  ;;  %v660_v55 = vadd.f32 %v1312_v48, %v1211_v56  ;;  %1338 = vmatmul.mubr.bf16.vlgmr.msra.gmra.mrb[0].mxu1 %v712_v29  ;;  %v651_v57 = vpop.f32.mrb[7].mxu0 }
  0xfa   : > { %v699_v61 = vmax.f32 %v649_v47, 0.0  ;;  %v652_v2 = vadd.f32 %v1211_v56, %v651_v57 }
  0xfb   : > { %v702_v27 = vmax.f32 %v660_v55, 0.0 }
  0xfc   : > { %v700_v13 = vmax.f32 %v652_v2, 0.0 }
  0xfd   : > { %v714_v58 = vpack.c.bf16 %v702_v27, %v701_v51 }
  0xfe   : > { %v713_v12 = vpack.c.bf16 %v700_v13, %v699_v61  ;;  %v1315_v0 = vpop.f32.mrb[8].mxu0 }
  0xff   : > { %v673_v14 = vadd.f32 %v1315_v0, %v1211_v56  ;;  %v664_v22 = vpop.f32.mrb[9].mxu0 }
 0x100   : > { %1341 = vmatprep.mubr.bf16.mxu1 %v713_v12  ;;  %v665_v24 = vadd.f32 %v1211_v56, %v664_v22  ;;  %v1316_v3 = vpop.f32.mrb[10].mxu0 }
 0x101   : > { %1342 = vmatmul.mubr.bf16.gmra.mrb[4].mxu1 %v714_v58  ;;  %v705_v28 = vmax.f32 %v673_v14, 0.0  ;;  %v676_v33 = vadd.f32 %v1316_v3, %v1211_v56  ;;  %v667_v41 = vpop.f32.mrb[11].mxu0 }
 0x102   : > { %v703_v42 = vmax.f32 %v665_v24, 0.0  ;;  %v668_v46 = vadd.f32 %v1211_v56, %v667_v41 }
 0x103   : > { %v706_v29 = vmax.f32 %v676_v33, 0.0 }
 0x104   : > { %v704_v48 = vmax.f32 %v668_v46, 0.0 }
 0x105   : > { %v716_v47 = vpack.c.bf16 %v706_v29, %v705_v28  ;;  %v1493_v28 = vmov 0.0  }
 0x106   : > { %v715_v57 = vpack.c.bf16 %v704_v48, %v703_v42  ;;  %v1319_v55 = vpop.f32.mrb[12].mxu0  ;;  %1353 = vmatprep.subr.bf16.mxu0 %v1493_v28  ;;  %423 = vst.msk [vmem:[#allocation4] sm:$0xff] %vm2003_vm0, %v1493_v28  ;;  %1373 = vmatprep.subr.bf16.mxu1 %v1493_v28  ;;  %vm1234_vm0 = vmpackc.low %vm465_vm4, %vm464_vm3 }
 0x107   : > { %v689_v2 = vadd.f32 %v1319_v55, %v1211_v56  ;;  %v680_v27 = vpop.f32.mrb[13].mxu0  ;;  %1374 = vmatpush3.bf16.msk.msra.mxu1 %vm1664_vm5, %v1232_v35  ;;  %1369 = vmatprep.mubr.msk.bf16.mxu0 %vm1494_vm2, %v1493_v28  ;;  %vm419_vm5 = vcmask 7168   ;;  %vm1243_vm3 = vmpackc.low %vm471_vm11, %vm470_vm10 }
 0x108   : > { %1345 = vmatprep.mubr.bf16.mxu1 %v715_v57  ;;  %v681_v51 = vadd.f32 %v1211_v56, %v680_v27  ;;  %v1320_v61 = vpop.f32.mrb[14].mxu0  ;;  %1375 = vmatprep.subr.bf16.mxu1 %v1493_v28  ;;  %421 = vst.msk [vmem:[#allocation3] sm:$0xff] %vm419_vm5, %v1493_v28  ;;  %vm1246_vm4 = vmpackc.low %vm473_vm13, %vm472_vm12 }
 0x109   : > { %1346 = vmatmul.mubr.bf16.gmra.mrb[8].mxu1 %v716_v47  ;;  %v709_v13 = vmax.f32 %v689_v2, 0.0  ;;  %v692_v12 = vadd.f32 %v1320_v61, %v1211_v56  ;;  %v683_v0 = vpop.f32.mrb[15].mxu0 }
 0x10a   : > { %v707_v58 = vmax.f32 %v681_v51, 0.0  ;;  %v684_v14 = vadd.f32 %v1211_v56, %v683_v0  ;;  %v1222_v56 = vld [vmem:[%s1996_s5] ss:$0 sm:$0xff] }
 0x10b   : > { %v710_v22 = vmax.f32 %v692_v12, 0.0  ;;  %1376 = vmatpush3.bf16.msk.msra.mxu1 %vm1234_vm0, %v1235_v43  ;;  %vm1240_vm0 = vmpackc.low %vm469_vm9, %vm468_vm8  ;;  %vm2009_vm9 = vcmask 261120  }
 0x10c   : > { %v708_v3 = vmax.f32 %v684_v14, 0.0  ;;  %1377 = vmatprep.subr.bf16.mxu1 %v1493_v28  ;;  %vm2010_vm10 = vmmov %vm2009_vm9 }
 0x10d   : > { %v718_v24 = vpack.c.bf16 %v710_v22, %v709_v13 }
 0x10e   : > { %v717_v41 = vpack.c.bf16 %v708_v3, %v707_v58 }
 0x10f   : > { %v974_v44 = vld [vmem:[#allocation3] sm:$0xff] }
 0x110   : > { %1349 = vmatprep.mubr.bf16.mxu1 %v717_v41 }
 0x111   : > { %1350 = vmatmul.mubr.bf16.gmra.mrb[12].mxu1 %v718_v24 }
 0x112   : > { %1389 = vmatprep.mubr.msk.bf16.mxu1 %vm1494_vm2, %v1493_v28 }
 0x1cc   : > { %v1339_v33 = vpop.f32.mrb[0].mxu1 }
 0x1cd   : > { %v833_v42 = vadd.f32 %v1339_v33, %v1222_v56  ;;  %v824_v46 = vpop.f32.mrb[1].mxu1 }
 0x1ce   : > { %v825_v29 = vadd.f32 %v1222_v56, %v824_v46  ;;  %v1340_v48 = vpop.f32.mrb[2].mxu1 }
 0x1cf   : > { %1433 = vtanh.f32 %v833_v42  ;;  %v836_v30 = vadd.f32 %v1340_v48, %v1222_v56  ;;  %v827_v31 = vpop.f32.mrb[3].mxu1 }
 0x1d0   : > { %1435 = vtanh.f32 %v825_v29  ;;  %v828_v32 = vadd.f32 %v1222_v56, %v827_v31 }
 0x1d1   : > { %1437 = vtanh.f32 %v836_v30 }
 0x1d2   : > { %1439 = vtanh.f32 %v828_v32 }
 0x1d4   : > { %v1343_v35 = vpop.f32.mrb[4].mxu1 }
 0x1d5   : > { %v849_v47 = vadd.f32 %v1343_v35, %v1222_v56  ;;  %v840_v57 = vpop.f32.mrb[5].mxu1 }
 0x1d6   : > { %v841_v55 = vadd.f32 %v1222_v56, %v840_v57  ;;  %v1344_v2 = vpop.f32.mrb[6].mxu1 }
 0x1d7   : > { %1441 = vtanh.f32 %v849_v47  ;;  %v852_v27 = vadd.f32 %v1344_v2, %v1222_v56  ;;  %v843_v51 = vpop.f32.mrb[7].mxu1 }
 0x1d8   : > { %1443 = vtanh.f32 %v841_v55  ;;  %v844_v61 = vadd.f32 %v1222_v56, %v843_v51 }
 0x1d9   : > { %v1434_v13 = vpop.eup %1433  ;;  %1445 = vtanh.f32 %v852_v27 }
 0x1da   : > { %v1436_v12 = vpop.eup %1435  ;;  %1447 = vtanh.f32 %v844_v61 }
 0x1db   : > { %v1438_v0 = vpop.eup %1437 }
 0x1dc   : > { %v1440_v58 = vpop.eup %1439  ;;  %v1347_v14 = vpop.f32.mrb[8].mxu1  ;;  %v905_v22 = vpack.c.bf16 %v1438_v0, %v1434_v13 }
 0x1dd   : > { %v904_v3 = vpack.c.bf16 %v1440_v58, %v1436_v12  ;;  %v865_v24 = vadd.f32 %v1347_v14, %v1222_v56  ;;  %v856_v41 = vpop.f32.mrb[9].mxu1 }
 0x1de   : > { %v857_v33 = vadd.f32 %v1222_v56, %v856_v41  ;;  %v1348_v42 = vpop.f32.mrb[10].mxu1 }
 0x1df   : > { %1354 = vmatpush3.bf16.xpose.msra.mxu0 %v904_v3  ;;  %1449 = vtanh.f32 %v865_v24  ;;  %v868_v46 = vadd.f32 %v1348_v42, %v1222_v56  ;;  %v859_v29 = vpop.f32.mrb[11].mxu1 }
 0x1e0   : > { %1451 = vtanh.f32 %v857_v33  ;;  %1355 = vmatprep.subr.bf16.mxu0 %v1493_v28  ;;  %v860_v48 = vadd.f32 %v1222_v56, %v859_v29 }
 0x1e1   : > { %v1442_v30 = vpop.eup %1441  ;;  %1453 = vtanh.f32 %v868_v46 }
 0x1e2   : > { %v1444_v31 = vpop.eup %1443  ;;  %1455 = vtanh.f32 %v860_v48 }
 0x1e3   : > { %v1446_v32 = vpop.eup %1445 }
 0x1e4   : > { %v1448_v35 = vpop.eup %1447  ;;  %v1351_v47 = vpop.f32.mrb[12].mxu1  ;;  %v907_v57 = vpack.c.bf16 %v1446_v32, %v1442_v30  ;;  %v954_v32 = vand.u32 127, %v427_v1  ;;  %v1496_v1 = vmov 0  }
 0x1e5   : > { %v906_v55 = vpack.c.bf16 %v1448_v35, %v1444_v31  ;;  %v881_v2 = vadd.f32 %v1351_v47, %v1222_v56  ;;  %v872_v27 = vpop.f32.mrb[13].mxu1  ;;  %v1495_v31 = vmov -1e+30   ;;  %1421 = vset.pattern.permute.xlu0 %v1496_v1  ;;  %1422 = vset.pattern.permute.xlu1 %v1496_v1 }
 0x1e6   : > { %v873_v51 = vadd.f32 %v1222_v56, %v872_v27  ;;  %v1352_v61 = vpop.f32.mrb[14].mxu1  ;;  %420 = vst.msk [vmem:[#allocation2] sm:$0xff] %vm419_vm5, %v1495_v31  ;;  %v955_v35 = vadd.s32 %v954_v32, %v1593_v6 }
 0x1e7   : > { %1356 = vmatpush3.bf16.xpose.msra.mxu0 %v905_v22  ;;  %1457 = vtanh.f32 %v881_v2  ;;  %v884_v13 = vadd.f32 %v1352_v61, %v1222_v56  ;;  %v875_v12 = vpop.f32.mrb[15].mxu1 }
 0x1e8   : > { %1357 = vmatprep.subr.bf16.mxu0 %v1493_v28  ;;  %1459 = vtanh.f32 %v873_v51  ;;  %v876_v0 = vadd.f32 %v1222_v56, %v875_v12  ;;  %v903_v56 = vld [vmem:[%s1997_s6] sm:$0xf]  ;;  %vm956_vm2 = vcmp.lt.s32.totalorder %v955_v35, %v1637_v25 }
 0x1e9   : > { %v1450_v58 = vpop.eup %1449  ;;  %1461 = vtanh.f32 %v884_v13 }
 0x1ea   : > { %v1452_v14 = vpop.eup %1451  ;;  %1463 = vtanh.f32 %v876_v0 }
 0x1eb   : > { %v1454_v3 = vpop.eup %1453 }
 0x1ec   : > { %v1456_v24 = vpop.eup %1455  ;;  %v909_v41 = vpack.c.bf16 %v1454_v3, %v1450_v58 }
 0x1ed   : > { %v908_v33 = vpack.c.bf16 %v1456_v24, %v1452_v14  ;;  %v959_v6 = vld [vmem:[#allocation2] sm:$0xff] }
 0x1ef   : > { %1358 = vmatpush3.bf16.xpose.msra.mxu0 %v906_v55 }
 0x1f0   : > { %1359 = vmatprep.subr.bf16.mxu0 %v1493_v28 }
 0x1f1   : > { %v1458_v42 = vpop.eup %1457 }
 0x1f2   : > { %v1460_v22 = vpop.eup %1459 }
 0x1f3   : > { %v1462_v46 = vpop.eup %1461 }
 0x1f4   : > { %v1464_v29 = vpop.eup %1463  ;;  %v911_v48 = vpack.c.bf16 %v1462_v46, %v1458_v42 }
 0x1f5   : > { %v910_v30 = vpack.c.bf16 %v1464_v29, %v1460_v22 }
 0x1f7   : > { %1360 = vmatpush3.bf16.xpose.msra.mxu0 %v907_v57 }
 0x1f8   : > { %1361 = vmatprep.subr.bf16.mxu0 %v1493_v28 }
 0x1ff   : > { %1362 = vmatpush3.bf16.xpose.msra.mxu0 %v908_v33 }
 0x200   : > { %1363 = vmatprep.subr.bf16.mxu0 %v1493_v28 }
 0x207   : > { %1364 = vmatpush3.bf16.xpose.msra.mxu0 %v909_v41 }
 0x208   : > { %1365 = vmatprep.subr.bf16.mxu0 %v1493_v28 }
 0x20f   : > { %1366 = vmatpush3.bf16.xpose.msra.mxu0 %v910_v30 }
 0x210   : > { %1367 = vmatprep.subr.bf16.mxu0 %v1493_v28 }
 0x217   : > { %1368 = vmatpush3.bf16.xpose.msra.mxu0 %v911_v48 }
 0x21e   : > { %1370 = vmatmul.mubr.bf16.vlgmr.msra.gmra.mrb[16].mxu0 %v903_v56 }
 0x2f1   : > { %v946_v47 = vpop.f32.mrb[16].mxu0 }
 0x2f2   : > { %v952_v57 = vmul.f32 0.088388346, %v946_v47  ;;  %v1371_v55 = vpop.f32.mrb[17].mxu0 }
 0x2f3   : > { %v949_v2 = vpop.f32.mrb[18].mxu0 }
 0x2f4   : > { %v1372_v27 = vpop.f32.mrb[19].mxu0  ;;  %v957_v51 = vsel %vm956_vm2, %v952_v57, -1e+30  ;;  %vm1237_vm2 = vmpackc.low %vm467_vm7, %vm466_vm6  ;;  %vm2007_vm7 = vcmp.lt.s32.totalorder %v1830_v40, %v1637_v25 }
 0x2f5   : > { %960 = vmax.xlane.f32.xlu0 %v957_v51  ;;  %958 = vst [vmem:[%s400_s22] sm:$0xff] %v957_v51  ;;  %1378 = vmatpush3.bf16.msk.msra.mxu1 %vm1237_vm2, %v1238_v49  ;;  %vm1249_vm6 = vmpackc.low %vm475_vm15, %vm474_vm14 }
 0x2f6   : > { %1379 = vmatprep.subr.bf16.mxu1 %v1493_v28  ;;  %vm1252_vm8 = vmpackc.low %vm2007_vm7, %vm476_vm1 }
 0x2f9   : > { %1380 = vmatpush3.bf16.msk.msra.mxu1 %vm1240_vm0, %v1241_v52  ;;  %v981_v52 = vld [vmem:[#allocation4] sm:$0xff] }
 0x2fa   : > { %1381 = vmatprep.subr.bf16.mxu1 %v1493_v28 }
 0x2fd   : > { %1382 = vmatpush3.bf16.msk.msra.mxu1 %vm1243_vm3, %v1244_v59 }
 0x2fe   : > { %1383 = vmatprep.subr.bf16.mxu1 %v1493_v28 }
 0x301   : > { %1384 = vmatpush3.bf16.msk.msra.mxu1 %vm1246_vm4, %v1247_v5 }
 0x302   : > { %1385 = vmatprep.subr.bf16.mxu1 %v1493_v28 }
 0x305   : > { %1386 = vmatpush3.bf16.msk.msra.mxu1 %vm1249_vm6, %v1250_v11 }
 0x306   : > { %1387 = vmatprep.subr.bf16.mxu1 %v1493_v28 }
 0x309   : > { %1388 = vmatpush3.bf16.msk.msra.mxu1 %vm1252_vm8, %v2008_v21 }
 0x382   : > { %v961_v15 = vpop.xlane.xlu0 %960 }
 0x383   : > { %v962_v16 = vmax.f32 %v959_v6, %v961_v15 }
 0x385   : > { %v963_v19 = vsub.f32 %v959_v6, %v962_v16  ;;  %1031 = vst.msk [vmem:[#allocation2] sm:$0xff] %vm419_vm5, %v962_v16  ;;  %968 = vperm.xlu0 %1421, %v962_v16  }
 0x387   : > { %v964_v39 = vmul.f32 1.442695, %v963_v19 }
 0x38c   : > { %v1037_v20 = vld [vmem:[#allocation2] sm:$0xff] }
 0x38d   : > { %1038 = vst.msk [vmem:[%s409_s24] sm:$0xff] %vm419_vm5, %v1037_v20 }
 0x404   : > { %v969_v23 = vpop.permute.xlu0 %968 }
 0x405   : > { %v971_v26 = vsub.f32 %v957_v51, %v969_v23 }
 0x407   : > { %v972_v36 = vmul.f32 1.442695, %v971_v26 }
 0x409   : > { %1465 = vpow2.f32 %v972_v36 }
 0x40a   : > { %1467 = vpow2.f32 %v964_v39 }
 0x413   : > { %v1466_v37 = vpop.eup %1465 }
 0x414   : > { %976 = vadd.xlane.f32.xlu1 %v1466_v37  ;;  %v988_v38 = vpack.c.bf16 %v1466_v37, %v1466_v37  ;;  %v1468_v43 = vpop.eup %1467 }
 0x415   : > { %v975_v25 = vmul.f32 %v1468_v43, %v974_v44 }
 0x416   : > { %1390 = vmatmul.mubr.bf16.vlgmr.msra.gmra.mrb[16].mxu1 %v988_v38 }
 0x425   : > { %984 = vperm.xlu1 %1422, %v1468_v43  }
 0x4a1   : > { %v977_v45 = vpop.xlane.xlu1 %976 }
 0x4a2   : > { %v978_v49 = vadd.f32 %v977_v45, %v975_v25 }
 0x4a4   : > { %980 = vst.msk [vmem:[#allocation3] sm:$0xff] %vm419_vm5, %v978_v49 }
 0x4a5   : > { %v985_v53 = vpop.permute.xlu1 %984 }
 0x4a6   : > { %v987_v54 = vmul.f32 %v985_v53, %v981_v52 }
 0x4ab   : > { %v1039_v50 = vld [vmem:[#allocation3] sm:$0xff] }
 0x4ac   : > { %1040 = vst.msk [vmem:[%s413_s27] sm:$0xff] %vm419_vm5, %v1039_v50 }
 0x4e9   : > { %v1023_v59 = vpop.f32.mrb[16].mxu1 }
 0x4ea   : > { %v1029_v60 = vadd.f32 %v1023_v59, %v987_v54  ;;  %v1391_v62 = vpop.f32.mrb[17].mxu1 }
 0x4eb   : > { %v1026_v63 = vpop.f32.mrb[18].mxu1 }
 0x4ec   : > { %1030 = vst.msk [vmem:[#allocation4] sm:$0xff] %vm2009_vm9, %v1029_v60  ;;  %v1392_v4 = vpop.f32.mrb[19].mxu1 }
 0x4f3   : > { %v1035_v5 = vld [vmem:[#allocation4] sm:$0xff] }
 0x4f4   : > { %1036 = vst.msk [vmem:[%s405_s30] sm:$0xff] %vm2010_vm10, %v1035_v5 }
 0x4f5 PF: > { %s22_s17 = sadd.s32 1, %s1491_s17   ;;  %s2011_s15 = smov %s1487_s16 }
 0x4f6   : > { %p19_p7 = scmp.ge.s32.totalorder %s22_s17, 4   ;;  %s2012_s16 = smov %s2014_s0 }
 0x4f8   :  { %21 = sbr.rel (!%p19_p7) target bundleno = 2 (0x2), region = 118 }

</bundles_post_ra>
